<compile_context>
chip_gen: v7x
topology: tpu7x:2x2x1
jax: 0.10.0
libtpu: 0.0.40
codegen_flags: <defaults>
</compile_context>

<pallas_src>
import functools

import jax
import jax.numpy as jnp
from jax import lax
from jax.experimental import pallas as pl
from jax.experimental.pallas import tpu as pltpu


def _maxpool_kernel(x_ref, s_ref, o_ref, *, ksize, stride, cb, th, wv, w_out,
                    mm_dtype, precision):
    """Max-pool CB channels of one (batch, H-tile) block.

    x_ref: (CB, R_in, W)   input tile (rows on sublanes, W on lanes)
    s_ref: (Wv, w_out)     one-hot lane-compaction matrix (constant block)
    o_ref: (CB, TH, w_out) output tile
    """
    W = x_ref.shape[-1]

    # --- H direction: ksize (sublane-strided) loads of the whole channel slab,
    #     reduced with max in the native dtype.
    rm = None
    for ki in range(ksize):
        h_idx = pl.ds(ki, th, stride=stride) if stride > 1 else pl.ds(ki, th)
        sl = x_ref[:, h_idx, :]                       # (CB, TH, W)
        rm = sl if rm is None else jnp.maximum(rm, sl)
    rm = rm.reshape(cb * th, W)                       # fold channels into matmul M

    # --- W direction, step 1: k-offset max in the lane domain (VPU/XLU), no MXU.
    wmax = rm[:, 0:wv]
    for kj in range(1, ksize):
        wmax = jnp.maximum(wmax, rm[:, kj:kj + wv])

    # --- W direction, step 2: lane compaction with ONE one-hot selection matmul (MXU).
    out = jnp.dot(wmax.astype(mm_dtype), s_ref[...],
                  preferred_element_type=jnp.float32, precision=precision)
    o_ref[...] = out.reshape(cb, th, w_out).astype(o_ref.dtype)


def _budgets():
    """(per-block byte budget, scoped VMEM limit) — generation aware."""
    try:
        vmem = int(getattr(pltpu.get_tpu_info(), "vmem_capacity_bytes",
                           64 * 1024 * 1024))
    except Exception:
        vmem = 64 * 1024 * 1024
    if vmem >= 96 * 1024 * 1024:                    # v5e / v6e: 128 MiB physical VMEM
        return 8 * 1024 * 1024, 64 * 1024 * 1024
    return 4 * 1024 * 1024, 32 * 1024 * 1024        # v7x: 64 MiB physical VMEM


def _choose_tiles(N, C, H, W, h_out, w_out, ksize, stride, itemsize, block_budget):
    """Pick (CB, TH, R_in): biggest blocks that fit the budget while keeping the
    grid >= 8 steps (dual-TC split on v7x + DMA/compute pipelining)."""
    sub = max(8, 32 // max(itemsize, 1))            # f32: 8, bf16: 16, int8: 32 sublanes

    if ksize <= stride:                             # windows never straddle H tiles
        th_cands = [t for t in range(sub, h_out + 1, sub) if h_out % t == 0]
        if h_out not in th_cands:
            th_cands.append(h_out)                  # full-height fallback always valid
    else:
        # TODO(synk): halo'd H tiling (manual DMA) for overlapping windows; full height
        # keeps it correct for ksize > stride at the cost of H-axis pipelining.
        th_cands = [h_out]

    cb_cands = [d for d in range(1, C + 1) if C % d == 0]

    def r_in_for(t):
        return H if t == h_out else t * stride

    best_key, best = None, None
    for t in th_cands:
        rin = r_in_for(t)
        for cb in cb_cands:
            blk = cb * (rin * W + t * w_out) * itemsize
            if blk > block_budget:
                continue
            steps = N * (C // cb) * (h_out // t)
            # prefer: enough grid steps (capped at 8), then bigger blocks, then fewer
            # total steps (less per-step overhead).
            key = (min(steps, 8), blk, -steps)
            if best_key is None or key > best_key:
                best_key, best = key, (cb, t, rin)
    if best is None:                                # nothing fits: smallest block
        t = min(th_cands)
        best = (1, t, r_in_for(t))
    return best


def max_pool_pallas(x_nchw, ksize, stride):
    """Equivalent of nn.MaxPool2d(kernel_size=ksize, stride=stride, padding=0)."""
    N, C, H, W = x_nchw.shape
    h_out = (H - ksize) // stride + 1
    w_out = (W - ksize) // stride + 1
    assert h_out > 0 and w_out > 0, "pooling window larger than input"
    wv = W - ksize + 1                              # valid W offsets after k-offset max

    itemsize = jnp.dtype(x_nchw.dtype).itemsize
    block_budget, vmem_limit = _budgets()
    cb, th, r_in = _choose_tiles(N, C, H, W, h_out, w_out, ksize, stride,
                                 itemsize, block_budget)

    # Matmul dtype / precision: bit-exact one-hot selection in every case.
    if x_nchw.dtype == jnp.float32:
        mm_dtype, precision = jnp.float32, lax.Precision.HIGHEST
    elif x_nchw.dtype == jnp.bfloat16:
        mm_dtype, precision = jnp.bfloat16, lax.Precision.DEFAULT
    else:
        # ints / other floats: route through f32 (exact for int8/int16/fp16 ranges).
        mm_dtype, precision = jnp.float32, lax.Precision.HIGHEST

    # One-hot lane-compaction matrix: sel[m, j] == 1  iff  m == j*stride.
    m_idx = jnp.arange(wv, dtype=jnp.int32)[:, None]
    j_idx = jnp.arange(w_out, dtype=jnp.int32)[None, :]
    sel = (m_idx == j_idx * stride).astype(mm_dtype)

    grid = (N, C // cb, h_out // th)
    kernel = functools.partial(
        _maxpool_kernel, ksize=ksize, stride=stride, cb=cb, th=th, wv=wv,
        w_out=w_out, mm_dtype=mm_dtype, precision=precision)

    flops = int(N * C * h_out * ((ksize - 1) * (W + wv) + 2 * wv * w_out))
    bytes_accessed = int((N * C * H * W + N * C * h_out * w_out) * itemsize
                         + wv * w_out * jnp.dtype(mm_dtype).itemsize)

    return pl.pallas_call(
        kernel,
        out_shape=jax.ShapeDtypeStruct((N, C, h_out, w_out), x_nchw.dtype),
        grid_spec=pltpu.PrefetchScalarGridSpec(
            num_scalar_prefetch=0,
            grid=grid,
            in_specs=[
                pl.BlockSpec((None, cb, r_in, W), lambda n, ci, hi: (n, ci, hi, 0)),
                pl.BlockSpec((wv, w_out), lambda n, ci, hi: (0, 0)),
            ],
            out_specs=pl.BlockSpec((None, cb, th, w_out),
                                   lambda n, ci, hi: (n, ci, hi, 0)),
        ),
        compiler_params=pltpu.CompilerParams(
            dimension_semantics=("parallel", "parallel", "parallel"),
            vmem_limit_bytes=vmem_limit,
        ),
        cost_estimate=pl.CostEstimate(
            flops=flops, transcendentals=0, bytes_accessed=bytes_accessed),
    )(x_nchw, sel)


if __name__ == "__main__":
    # darknet block config: {'size': 2, 'stride': 2}
    block = {"size": "2", "stride": "2"}
    ksize = int(block["size"])
    stride = int(block["stride"])

    key = jax.random.PRNGKey(0)
    x = jax.random.normal(key, (2, 4, 16, 16), dtype=jnp.float32)  # NCHW

    out = jax.block_until_ready(max_pool_pallas(x, ksize, stride))

    ref = lax.reduce_window(
        x,
        -jnp.inf,
        lax.max,
        window_dimensions=(1, 1, ksize, ksize),
        window_strides=(1, 1, stride, stride),
        padding="VALID",
    )
    assert out.shape == ref.shape
    assert bool(jnp.allclose(out, ref, rtol=1e-6, atol=1e-6))
    print("KERNEL_OK")
</pallas_src>

<mosaic_0001>
module attributes {stable_mosaic.version = 11 : i64} {
  func.func @_maxpool_kernel(%arg0: i32, %arg1: i32, %arg2: i32, %arg3: memref<1x1x16x16xf32, #tpu.memory_space<vmem>>, %arg4: memref<15x8xf32, #tpu.memory_space<vmem>>, %arg5: memref<1x1x8x8xf32, #tpu.memory_space<vmem>>) attributes {dimension_semantics = [#tpu.dimension_semantics<parallel>, #tpu.dimension_semantics<parallel>, #tpu.dimension_semantics<parallel>], iteration_bounds = array<i64: 2, 4, 1>, scalar_prefetch = 0 : i64, scratch_operands = 0 : i64, tpu.core_type = #tpu.core_type<tc>, window_params = [{transform_indices = @transform_0, window_bounds = array<i64: 1, 1, 16, 16>}, {pipeline_mode = #tpu.pipeline_mode<synchronous>, transform_indices = @transform_1, window_bounds = array<i64: 15, 8>}, {transform_indices = @transform_2, window_bounds = array<i64: 1, 1, 8, 8>}]} {
    %c0 = arith.constant 0 : index
    %c0_0 = arith.constant 0 : index
    %c0_1 = arith.constant 0 : index
    %c0_2 = arith.constant 0 : index
    %0 = tpu.strided_load %arg3[%c0, %c0_0, %c0_1, %c0_2] {strides = array<i32: 1, 1, 2, 1>} : memref<1x1x16x16xf32, #tpu.memory_space<vmem>>, vector<1x1x8x16xf32>
    %1 = vector.shape_cast %0 : vector<1x1x8x16xf32> to vector<1x8x16xf32>
    %c0_3 = arith.constant 0 : index
    %c0_4 = arith.constant 0 : index
    %c1 = arith.constant 1 : index
    %c0_5 = arith.constant 0 : index
    %2 = tpu.strided_load %arg3[%c0_3, %c0_4, %c1, %c0_5] {strides = array<i32: 1, 1, 2, 1>} : memref<1x1x16x16xf32, #tpu.memory_space<vmem>>, vector<1x1x8x16xf32>
    %3 = vector.shape_cast %2 : vector<1x1x8x16xf32> to vector<1x8x16xf32>
    %4 = arith.maximumf %1, %3 : vector<1x8x16xf32>
    %5 = vector.shape_cast %4 : vector<1x8x16xf32> to vector<8x16xf32>
    %6 = vector.extract_strided_slice %5 {offsets = [0, 0], sizes = [8, 15], strides = [1, 1]} : vector<8x16xf32> to vector<8x15xf32>
    %7 = vector.extract_strided_slice %5 {offsets = [0, 1], sizes = [8, 15], strides = [1, 1]} : vector<8x16xf32> to vector<8x15xf32>
    %8 = arith.maximumf %6, %7 : vector<8x15xf32>
    %c0_6 = arith.constant 0 : index
    %c0_7 = arith.constant 0 : index
    %9 = vector.load %arg4[%c0_6, %c0_7] : memref<15x8xf32, #tpu.memory_space<vmem>>, vector<15x8xf32>
    %cst = arith.constant dense<0.000000e+00> : vector<8x8xf32>
    %10 = tpu.matmul %8, %9, %cst {dimension_numbers = #tpu.dot_dimension_numbers<[1], [0], [0], [1], [0, 0, 1, 1], [], []>, precision = #tpu.contract_precision<fp32>} : vector<8x15xf32>, vector<15x8xf32>, vector<8x8xf32> -> vector<8x8xf32>
    %11 = vector.shape_cast %10 : vector<8x8xf32> to vector<1x8x8xf32>
    %c0_8 = arith.constant 0 : index
    %c0_9 = arith.constant 0 : index
    %c0_10 = arith.constant 0 : index
    %c0_11 = arith.constant 0 : index
    %12 = vector.load %arg5[%c0_8, %c0_9, %c0_10, %c0_11] : memref<1x1x8x8xf32, #tpu.memory_space<vmem>>, vector<1x1x8x8xf32>
    %13 = vector.shape_cast %12 : vector<1x1x8x8xf32> to vector<1x8x8xf32>
    %14 = vector.shape_cast %11 : vector<1x8x8xf32> to vector<1x1x8x8xf32>
    tpu.vector_store %arg5[%c0_8, %c0_9, %c0_10, %c0_11], %14 {strides = array<i32>} : memref<1x1x8x8xf32, #tpu.memory_space<vmem>>, vector<1x1x8x8xf32>,
    return
  }
  func.func @transform_0(%arg0: i32, %arg1: i32, %arg2: i32) -> (i32, i32, i32, i32) {
    %c0_i32 = arith.constant 0 : i32
    %c0_i32_0 = arith.constant 0 : i32
    return %arg0, %arg1, %arg2, %c0_i32 : i32, i32, i32, i32
  }
  func.func @transform_1(%arg0: i32, %arg1: i32, %arg2: i32) -> (i32, i32) {
    %c0_i32 = arith.constant 0 : i32
    %c0_i32_0 = arith.constant 0 : i32
    %c0_i32_1 = arith.constant 0 : i32
    return %c0_i32, %c0_i32_0 : i32, i32
  }
  func.func @transform_2(%arg0: i32, %arg1: i32, %arg2: i32) -> (i32, i32, i32, i32) {
    %c0_i32 = arith.constant 0 : i32
    %c0_i32_0 = arith.constant 0 : i32
    return %arg0, %arg1, %arg2, %c0_i32 : i32, i32, i32, i32
  }
}

</mosaic_0001>

<bundles_post_ra>
// kernel: tpu_custom_call.1
= control target key start
LH: loop header
LB: loop body
LE: loop exit
PB: predicated region body
PF: predicated region fallthrough
CT: control target
= control target key end

     0   :  { %7 = vsyncpa [#allocation3], 0  ;;  %s1330_s0 = inlined_call_operand.hbm [shape: f32[2,4,16,16], index: 0, kind: input, shape index: {}]   ;;  %s1331_s1 = inlined_call_operand.vmem [shape: f32[15,8], index: 1, kind: input, shape index: {}]   ;;  %s1332_s2 = inlined_call_operand.hbm [shape: f32[2,4,8,8], index: 2, kind: output, shape index: {}]  }
   0x1   :  { %9 = vsyncpa [#allocation3 + $0x1], 0 }
   0x2   :  { %10 = vsyncpa [#allocation4], 0 }
   0x3   :  { %12 = vsyncpa [#allocation4 + $0x1], 0  ;;  %s1124_s9 = smov 0   ;;  %s1126_s10 = smov 0  }
   0x4   :  { %s1128_s11 = smov 0   ;;  %s1130_s12 = smov 0  }
   0x5   :  { %s1132_s13 = smov 0   ;;  %s1134_s14 = smov 0  }
   0x6   :  { %s1136_s15 = smov 0   ;;  %s1138_s16 = smov 0  }
   0x7 LB: > { %s783_s17 = sadd.s32 4294967295, %s1099_s16   ;;  %s784_s18 = sadd.s32 4294967294, %s1099_s16   ;;  %s1099_s16 = sphi %s1138_s16, %s18_s16   ;;  %s1095_s15 = sphi %s1136_s15, %s1347_s15   ;;  %s1091_s14 = sphi %s1134_s14, %s1346_s14   ;;  %s1087_s13 = sphi %s1132_s13, %s1345_s13   ;;  %s1083_s12 = sphi %s1130_s12, %s1344_s12   ;;  %s1079_s11 = sphi %s1128_s11, %s1343_s11   ;;  %s1075_s10 = sphi %s1126_s10, %s1342_s10   ;;  %s1071_s9 = sphi %s1124_s9, %s1341_s9  }
   0x8   : > { %s33_s19 = sadd.s32 1, %s1091_s14  ;;  %s37_s20 = sadd.s32 1, %s1095_s15 }
   0x9   : > { %p35_p0 = scmp.ge.s32.totalorder %s33_s19, 4  ;;  %s48_s21 = sadd.s32 1, %s1079_s11 }
   0xa   : > { %p55_p1 = scmp.ne.s32.totalorder %s1079_s11, %s1075_s10  ;;  %p56_p2 = scmp.eq.s32.totalorder %s1099_s16, 0 }
   0xb   : > { %s1349_s19 = smov (%p35_p0, %s33_s19), 0  ;;  %s1351_s20 = smov (!%p35_p0, %s37_s20), %s1095_s15 }
   0xc   : > { %s42_s22 = ssub.s32 %s1091_s14, %s1349_s19  ;;  %p1177_p3 = por %p56_p2, %p55_p1 }
   0xd   : > { %p39_p4 = scmp.ge.s32.totalorder %s1351_s20, 2  ;;  %p61_p5 = scmp.ne.s32.totalorder %s1075_s10, %s1071_s9 }
   0xe   : > { %p62_p6 = scmp.eq.s32.totalorder %s783_s17, 0  ;;  %p110_p7 = scmp.eq.s32.totalorder %s783_s17, 7 }
   0xf   : > { %s1353_s20 = smov (%p39_p4, %s1351_s20), 0  ;;  %p116_p10 = scmp.eq.s32.totalorder %s784_s18, 7 }
  0x10   : > { %p1185_p8 = por %p62_p6, %p61_p5  ;;  %p1189_p9 = por %p110_p7, %p55_p1 }
  0x11   : > { %s41_s26 = ssub.s32 %s1095_s15, %s1353_s20  ;;  %p1195_p12 = por %p116_p10, %p61_p5 }
  0x12   : > { %s1336_s25 = scalar_select %p1189_p9, 1, 0 }
  0x13   : > { %s43_s27 = sor.u32 %s42_s22, %s41_s26  ;;  %p899_p13 = scmp.lt.s32.totalorder %s1099_s16, 8 }
  0x14   : > { %p46_p11 = scmp.eq.s32.totalorder %s43_s27, 0  ;;  %s139_s29 = sand.u32 1, %s1079_s11  }
  0x15   : > { %s1337_s28 = scalar_select %p1195_p12, 1, 0 }
  0x16   : > { %s1202_s30 = scalar_select %p46_p11, %s1079_s11, %s48_s21  }
  0x17   : > { %s787_s3 = sshll.u32 %s139_s29, 4  ;;  %s788_s4 = sshll.u32 %s1091_s14, 1 }
  0x18   : > { %s789_s5 = sshll.u32 %s1095_s15, 3  ;;  %s143_s6 = scalar_lea.vmem [#allocation2], %s787_s3 }
  0x19   : > { %s154_s7 = sshll.u32 %s143_s6, 4  ;;  %s151_s8 = sadd.s32 %s789_s5, %s788_s4  ;;  %s1206_s7 = int_to_ptr.vmem [resolvable:$true] %s154_s7 }
  0x1a   : > { %s790_s17 = sshll.u32 %s151_s8, 7  ;;  %p1210_p0 = pnand %p899_p13, %p1177_p3 }
  0x1b   : > { %s1217_s21 = scalar_lea.hbm %s1330_s0, %s790_s17  ;;  %s1219_s27 = scalar_lea.sflag [#allocation3], %s139_s29 }
  0x1c   : > { %s971_s3 = scalar_lea.hbm %s1217_s21, 256  ;;  %p973_p2 = pneg %p1210_p0 }
  0x1d   : > { %p972_p1 = scmp.ne.s32.totalorder %s1217_s21, %s971_s3  ;;  %s976_s5 = scalar_lea.hbm %s1330_s0, 2048 }
  0x1e   : > { %p977_p5 = scmp.lt.u32.totalorder %s1217_s21, %s1330_s0  ;;  %p978_p6 = scmp.lt.u32.totalorder %s976_s5, %s971_s3 }
  0x1f   : > { %p974_p3 = pnand %p973_p2, %p972_p1  ;;  %p980_p10 = scmp.lt.u32.totalorder %s971_s3, %s1217_s21 }
  0x20   : > { %p979_p7 = por %p978_p6, %p977_p5 }
  0x21   : > { %p975_p4 = pneg %p974_p3 }
  0x22   : > { %p981_p11 = por %p980_p10, %p979_p7 }
  0x24   : > { %p982_p13 = pnand %p981_p11, %p975_p4 }
  0x26   : > { %985 = shalt.err (!%p982_p13)
}
  0x27   : > { %s986_s29 = scalar_lea.vmem %s1206_s7, 256  ;;  %s1101_s17 = smov [#allocation2]  }
  0x28   : > { %p987_p1 = scmp.ne.s32.totalorder %s1206_s7, %s986_s29  ;;  %s991_s22 = sshll.u32 %s1101_s17, 4  ;;  %s992_s22 = int_to_ptr.vmem [resolvable:$false] %s991_s22 }
  0x29   : > { %s993_s26 = scalar_lea.vmem %s992_s22, 512  ;;  %p994_p9 = scmp.lt.s32.totalorder %s1206_s7, %s992_s22 }
  0x2a   : > { %p989_p3 = pnand %p987_p1, %p973_p2  ;;  %p995_p5 = scmp.lt.s32.totalorder %s993_s26, %s986_s29 }
  0x2c   : > { %p990_p12 = pneg %p989_p3  ;;  %p996_p6 = por %p995_p5, %p994_p9 }
  0x2e   : > { %p997_p7 = pnand %p996_p6, %p990_p12 }
  0x30   : > { %1000 = shalt.err (!%p997_p7)
}
  0x31   : > { %s1102_s3 = smov 128   ;;  %s1103_s23 = smov 8  }
  0x32   : > { %894 = dma.hbm_to_vmem [thread:$0]  (!%p1210_p0), %s1217_s21, 256, %s1206_s7, %s1219_s27, %s1102_s3, %s1102_s3, %s1103_s23  }
  0x33   : > { %p791_p2 = scmp.ge.s32.totalorder %s1099_s16, 1  ;;  %p162_p4 = scmp.lt.s32.totalorder %s1099_s16, 9 }
  0x35   : > { %p163_p10 = pnand %p791_p2, %p162_p4 }
  0x36   : > { %s1250_s4 = sand.u32 (!%p163_p10), 1, %s1075_s10  }
  0x37   : > { %166 = sbr.rel (%p163_p10) target bundleno = 439 (0x1b7), region = 28  ;;  %s792_s5 = sshll.u32 (!%p163_p10), %s1250_s4, 4 }
  0x38   : > { %s169_s6 = scalar_lea.sflag (!%p163_p10), [#allocation3], %s1250_s4  ;;  %s172_s8 = scalar_lea.vmem (!%p163_p10), [#allocation2], %s792_s5 }
  0x3e   : > { %1062 = dma.done.wait (%p1185_p8), %s169_s6, 256  }
  0x3f   : > { %1064 = vsyncadd (%p1185_p8), %s169_s6, 4294967040  ;;  %v1104_v0 = vmov 0.0|0.0   ;;  %vm1105_vm0 = vmmov 0   ;;  %v1106_v1 = vmov 0.0   ;;  %vm209_vm1 = vcmask 1046528   ;;  %v203_v4 = vld [vmem:[%s1331_s1] sm:$0xff] }
  0x40   : > { %869 = vmatprep.subr.bf16.mxu0 %v1104_v0  ;;  %860 = vmatprep.subr.bf16.mxu1 %v1104_v0  ;;  %v194_v2 = vld [vmem:[%s172_s8] ss:$2 sm:$0xff]  ;;  %v794_v3 = vld [vmem:[%s172_s8 + $0x1] ss:$2 sm:$0xff]  ;;  %v214_v7 = vand.u32 4294901760, %v203_v4  ;;  %s1107_s27 = smov 127  }
  0x41   : > { %843 = vmatprep.mubr.msk.f32.mxu0 %vm1105_vm0, %v1106_v1  ;;  %822 = vmatprep.mubr.msk.f32.mxu1 %vm1105_vm0, %v1106_v1  ;;  %v197_v5 = vmax.f32 %v194_v2, %v794_v3  ;;  %v204_v6 = vld [vmem:[%s1331_s1 + $0x8] sm:$0x7f]  ;;  %vm205_vm2 = vcmask 121856   ;;  %s793_s29 = sshll.u32 %s1250_s4, 3  ;;  %s796_s17 = sshll.u32 %s1087_s13, 2  ;;  %vm672_vm3 = vcmask 64512  }
  0x42   : > { %v211_v8 = vsel %vm209_vm1, %v204_v6, 0  ;;  %v292_v10 = vsub.f32 %v203_v4, %v214_v7  ;;  %s687_s22 = sadd.s32 %s1083_s12, %s796_s17  ;;  %s192_s3 = scalar_lea.vmem [#allocation5], %s793_s29 }
  0x43   : > { %199 = vrot.lane.b32.xlu0 %v197_v5, %s1107_s27  ;;  %v217_v9 = vand.u32 4294901760, %v211_v8  ;;  %s797_s26 = sshll.u32 %s687_s22, 7  ;;  %s691_s23 = sshll.u32 %s192_s3, 4  ;;  %s1278_s23 = int_to_ptr.vmem [resolvable:$true] %s691_s23 }
  0x44   : > { %v293_v13 = vand.u32 4294901760, %v292_v10  ;;  %s1276_s8 = scalar_lea.hbm %s1332_s2, %s797_s26  ;;  %s675_s12 = scalar_lea.sflag [#allocation4], %s1250_s4 }
  0x45   : > { %v861_v11 = vpack.c.bf16 %v217_v9, %v214_v7  ;;  %v299_v12 = vsub.f32 %v211_v8, %v217_v9  ;;  %s1001_s13 = scalar_lea.vmem %s1278_s23, 128  ;;  %p1339_p9 = scmp.ne.s32.totalorder %s1336_s25, 0 }
  0x46   : > { %v294_v14 = vsub.f32 %v292_v10, %v293_v13  ;;  %p1002_p8 = scmp.ne.s32.totalorder %s1278_s23, %s1001_s13  ;;  %s1108_s7 = smov [#allocation5]  }
  0x47   : > { %871 = vmatpush3.bf16.msra.mxu0 %v861_v11  ;;  %862 = vmatpush3.bf16.msra.mxu1 %v861_v11  ;;  %v300_v15 = vand.u32 4294901760, %v299_v12  ;;  %v867_v20 = vpack.c.bf16 %v299_v12, %v292_v10  ;;  %s1005_s18 = sshll.u32 %s1108_s7, 4  ;;  %s1006_s18 = int_to_ptr.vmem [resolvable:$false] %s1005_s18 }
  0x48   : > { %863 = vmatprep.subr.bf16.mxu1 %v1104_v0  ;;  %872 = vmatprep.subr.bf16.mxu0 %v1104_v0  ;;  %v295_v16 = vand.u32 4294901760, %v294_v14  ;;  %p1003_p12 = pnand %p1002_p8, %p1339_p9  ;;  %s1007_s21 = scalar_lea.vmem %s1006_s18, 256 }
  0x49   : > { %v301_v17 = vsub.f32 %v299_v12, %v300_v15  ;;  %v873_v18 = vpack.c.bf16 %v300_v15, %v293_v13  ;;  %p1008_p11 = scmp.lt.s32.totalorder %s1278_s23, %s1006_s18  ;;  %p1009_p13 = scmp.lt.s32.totalorder %s1007_s21, %s1001_s13 }
  0x4a   : > { %p1004_p0 = pneg %p1003_p12 }
  0x4b   : > { %v302_v19 = vand.u32 4294901760, %v301_v17  ;;  %p1010_p1 = por %p1009_p13, %p1008_p11 }
  0x4d   : > { %v864_v21 = vpack.c.bf16 %v302_v19, %v295_v16  ;;  %p1011_p3 = pnand %p1010_p1, %p1004_p0 }
  0xb5   : > { %v200_v22 = vpop.permute.xlu0 %199 }
  0xb6   : > { %v202_v23 = vmax.f32 %v197_v5, %v200_v22 }
  0xb8   : > { %v207_v24 = vsel %vm205_vm2, %v202_v23, 0 }
  0xb9   : > { %v280_v25 = vand.u32 4294901760, %v207_v24 }
  0xbb   : > { %v281_v26 = vsub.f32 %v207_v24, %v280_v25 }
  0xbd   : > { %v282_v27 = vand.u32 4294901760, %v281_v26 }
  0xbf   : > { %844 = vmatmul.mubr.f32.vlgmr.msra.gmra.mrb[0].mxu0 %v282_v27  ;;  %v283_v28 = vsub.f32 %v281_v26, %v282_v27 }
  0xc0   : > { %874 = vmatpush3.bf16.msra.mxu0 %v873_v18  ;;  %850 = vmatprep.mubr.msk.f32.mxu0 %vm1105_vm0, %v1106_v1 }
  0xc1   : > { %v284_v29 = vand.u32 4294901760, %v283_v28  ;;  %875 = vmatprep.subr.bf16.mxu0 %v1104_v0 }
  0xc3   : > { %823 = vmatmul.mubr.f32.vlgmr.msra.gmra.mrb[0].mxu1 %v284_v29 }
  0xc4   : > { %865 = vmatpush3.bf16.msra.mxu1 %v864_v21  ;;  %829 = vmatprep.mubr.msk.f32.mxu1 %vm1105_vm0, %v1106_v1 }
  0xc5   : > { %866 = vmatprep.subr.bf16.mxu1 %v1104_v0 }
  0xc7   : > { %851 = vmatmul.mubr.f32.vlgmr.msra.gmra.mrb[0].mxu0 %v280_v25 }
  0xc8   : > { %877 = vmatpush3.bf16.msra.mxu0 %v861_v11  ;;  %857 = vmatprep.mubr.msk.f32.mxu0 %vm1105_vm0, %v1106_v1 }
  0xcb   : > { %830 = vmatmul.mubr.f32.vlgmr.msra.gmra.mrb[0].mxu1 %v280_v25 }
  0xcc   : > { %868 = vmatpush3.bf16.msra.mxu1 %v867_v20  ;;  %836 = vmatprep.mubr.msk.f32.mxu1 %vm1105_vm0, %v1106_v1 }
  0xcf   : > { %858 = vmatmul.mubr.f32.vlgmr.msra.gmra.mrb[0].mxu0 %v280_v25 }
  0xd3   : > { %837 = vmatmul.mubr.f32.vlgmr.msra.gmra.mrb[0].mxu1 %v281_v26 }
 0x1a2   : > { %v668_v30 = vpop.f32.mrb[0].mxu0 }
 0x1a3   : > { %v859_v31 = vpop.f32.mrb[1].mxu0 }
 0x1a6   : > { %v443_v32 = vpop.f32.mrb[0].mxu1 }
 0x1a7   : > { %v878_v33 = vadd.f32 %v668_v30, %v443_v32  ;;  %v838_v34 = vpop.f32.mrb[1].mxu1 }
 0x1a9   : > { %673 = vst.msk [vmem:[%s192_s3] sm:$0xff] %vm672_vm3, %v878_v33 }
 0x1aa   : > { %1014 = shalt.err (!%p1011_p3)
}
 0x1ab   : > { %s1015_s4 = scalar_lea.hbm %s1276_s8, 128  ;;  %s1019_s29 = scalar_lea.hbm %s1332_s2, 1024 }
 0x1ac   : > { %p1016_p5 = scmp.ne.s32.totalorder %s1276_s8, %s1015_s4  ;;  %p1020_p2 = scmp.lt.u32.totalorder %s1276_s8, %s1332_s2 }
 0x1ad   : > { %p1021_p4 = scmp.lt.u32.totalorder %s1019_s29, %s1015_s4  ;;  %p1023_p8 = scmp.lt.u32.totalorder %s1015_s4, %s1276_s8 }
 0x1ae   : > { %p1017_p6 = pnand %p1016_p5, %p1339_p9 }
 0x1af   : > { %p1022_p10 = por %p1021_p4, %p1020_p2 }
 0x1b0   : > { %p1018_p7 = pneg %p1017_p6 }
 0x1b1   : > { %p1024_p12 = por %p1023_p8, %p1022_p10 }
 0x1b3   : > { %p1025_p0 = pnand %p1024_p12, %p1018_p7 }
 0x1b5   : > { %1028 = shalt.err (!%p1025_p0)
}
 0x1b6   : > { %889 = dma.vmem_to_hbm [thread:$0]  (%p1339_p9), %s1278_s23, 128, %s1276_s8, %s675_s12  }
 0x1b7 PF: > { %p900_p11 = scmp.ge.s32.totalorder %s1099_s16, 2  ;;  %s703_s26 = sand.u32 1, %s1071_s9  }
 0x1b8   : > { %p1340_p13 = scmp.ne.s32.totalorder %s1337_s28, 0  ;;  %s704_s3 = scalar_lea.sflag [#allocation4], %s703_s26 }
 0x1ba   : > { %p896_p1 = pnand %p900_p11, %p1340_p13 }
 0x1bc   : > { %1066 = dma.done.wait (!%p896_p1), %s704_s3, 128  }
 0x1bd   : > { %1068 = vsyncadd (!%p896_p1), %s704_s3, 4294967168  ;;  %s18_s16 = sadd.s32 1, %s1099_s16   ;;  %s1341_s9 = smov %s1075_s10 }
 0x1be   : > { %p15_p3 = scmp.ge.s32.totalorder %s18_s16, 10   ;;  %s1342_s10 = smov %s1079_s11 }
 0x1bf   : > { %s1343_s11 = smov %s1202_s30  ;;  %s1344_s12 = smov %s1091_s14 }
 0x1c0   : > { %s1345_s13 = smov %s1095_s15  ;;  %s1346_s14 = smov %s1349_s19 }
 0x1c1   : > { %s1347_s15 = smov %s1353_s20  ;;  %17 = sbr.rel (!%p15_p3) target bundleno = 7 (0x7), region = 74 }
 0x1c8   :  { %709 = vsyncpa [#allocation3], 1 }
 0x1c9   :  { %711 = vsyncpa [#allocation3 + $0x1], 1 }
 0x1ca   :  { %712 = vsyncpa [#allocation4], 1 }
 0x1cb   :  { %714 = vsyncpa [#allocation4 + $0x1], 1 }

</bundles_post_ra>
